<compile_context>
chip_gen: v7x
topology: tpu7x:2x2x1
jax: 0.10.0
libtpu: 0.0.40
codegen_flags: <defaults>
</compile_context>

<pallas_src>
import functools

import jax
import jax.numpy as jnp
from jax.experimental import pallas as pl
from jax.experimental.pallas import tpu as pltpu


# ----------------------------------------------------------------------------
# Pallas kernel: fused channel attention
# ----------------------------------------------------------------------------
def ca_kernel(x_ref, w1_ref, b1_ref, w2_ref, b2_ref, o_ref, *, hw):
    """Fused CALayer over one block of batch elements.

    x_ref : (B, C, HWp)  activation; channels on sublanes, H*W (padded) on lanes
    w1_ref: (C, Cr)      down-projection weight  (= conv_du['0'].weight.reshape(Cr, C).T)
    b1_ref: (1, Cr)      down-projection bias
    w2_ref: (C, Cr)      up-projection weight    (= conv_du['1'].weight.reshape(C, Cr))
    b2_ref: (C, 1)       up-projection bias
    o_ref : (B, C, HWp)  output = x * sigmoid(W2 @ relu(W1 @ mean(x) + b1) + b2)
    """
    inv_hw = jnp.float32(1.0 / hw)
    B = x_ref.shape[0]
    # B is tiny (1 when batch is on the grid, N when folded) -> static unroll.
    for b in range(B):
        # Global average pool: lane-axis reduce, divide by the REAL H*W
        # (padded lanes are zero so they don't perturb the sum).
        m = jnp.sum(x_ref[b].astype(jnp.float32), axis=-1, keepdims=True) * inv_hw  # (C, 1)

        # FC1 (C -> Cr) + ReLU as broadcast-mul + sublane reduce (VPU/XLU).
        y1 = jnp.sum(w1_ref[...] * m, axis=0, keepdims=True) + b1_ref[...]          # (1, Cr)
        y1 = jnp.maximum(y1, 0.0)

        # FC2 (Cr -> C) + sigmoid as broadcast-mul + lane reduce.
        y2 = jnp.sum(w2_ref[...] * y1, axis=1, keepdims=True) + b2_ref[...]         # (C, 1)
        y2 = jax.nn.sigmoid(y2)

        # Per-channel scale; re-read x_ref instead of holding an f32 copy
        # live across the whole pool -> FC -> scale dependency chain.
        o_ref[b] = (x_ref[b].astype(jnp.float32) * y2).astype(o_ref.dtype)


# ----------------------------------------------------------------------------
# Wrapper
# ----------------------------------------------------------------------------
def ca_layer(x_nchw, w1t, b1, w2, b2, *, batch_grid=None,
             vmem_budget_bytes=12 << 20):
    """CALayer forward.

    x_nchw: (N, C, H, W)  input, PyTorch NCHW layout
    w1t   : (C, Cr)       = conv_du['0'].weight.reshape(Cr, C).T
    b1    : (Cr,)         = conv_du['0'].bias
    w2    : (C, Cr)       = conv_du['1'].weight.reshape(C, Cr)
    b2    : (C,)          = conv_du['1'].bias
    batch_grid:
        None  -> auto: fold the whole batch into one block when it fits the
                 VMEM budget (best on single-TC v5e/v6e and for small N),
                 otherwise iterate the batch on the grid.
        True  -> force grid=(N,) with "parallel" semantics (use on v7x with
                 N > 1 to shard batch elements across the 2 TensorCores).
    """
    N, C, H, W = x_nchw.shape
    HW = H * W
    Cr = w1t.shape[-1]

    # Lane padding: keep the last (lane) axis a multiple of 128 so the
    # write-back is unmasked full-width vector stores.
    HWp = pl.cdiv(HW, 128) * 128
    x2 = x_nchw.reshape(N, C, HW)
    if HWp != HW:
        x2 = jnp.pad(x2, ((0, 0), (0, 0), (0, HWp - HW)))

    itemsize = jnp.dtype(x_nchw.dtype).itemsize
    full_block_bytes = N * C * HWp * itemsize
    # Live VMEM ~= double-buffered input + output blocks = 4x one block.
    fits = 4 * full_block_bytes <= vmem_budget_bytes
    if batch_grid is None:
        batch_grid = not fits

    if batch_grid:
        grid = (N,)
        x_spec = pl.BlockSpec((1, C, HWp), lambda n: (n, 0, 0))
        o_spec = pl.BlockSpec((1, C, HWp), lambda n: (n, 0, 0))
        dims = ("parallel",)
        per_block_bytes = C * HWp * itemsize
    else:
        grid = (1,)
        x_spec = pl.BlockSpec((N, C, HWp), lambda n: (0, 0, 0))
        o_spec = pl.BlockSpec((N, C, HWp), lambda n: (0, 0, 0))
        dims = ("arbitrary",)
        per_block_bytes = full_block_bytes

    cp_kwargs = dict(dimension_semantics=dims)
    live_bytes = 4 * per_block_bytes + (1 << 20)   # + slack for weights/scratch
    if live_bytes > (16 << 20):                    # conservative (v5e) scoped default
        cp_kwargs["vmem_limit_bytes"] = min(live_bytes, 100 << 20)

    kernel = functools.partial(ca_kernel, hw=HW)
    out = pl.pallas_call(
        kernel,
        out_shape=jax.ShapeDtypeStruct((N, C, HWp), x_nchw.dtype),
        grid=grid,
        in_specs=[
            x_spec,
            pl.BlockSpec((C, Cr), lambda n: (0, 0)),
            pl.BlockSpec((1, Cr), lambda n: (0, 0)),
            pl.BlockSpec((C, Cr), lambda n: (0, 0)),
            pl.BlockSpec((C, 1), lambda n: (0, 0)),
        ],
        out_specs=o_spec,
        compiler_params=pltpu.CompilerParams(**cp_kwargs),
    )(x2, w1t, b1.reshape(1, Cr), w2, b2.reshape(C, 1))

    if HWp != HW:
        out = out[..., :HW]
    return out.reshape(N, C, H, W)


# ----------------------------------------------------------------------------
# Pure-JAX reference (for correctness check)
# ----------------------------------------------------------------------------
def _ref_ca_layer(x, w1t, b1, w2, b2):
    pooled = jnp.mean(x, axis=(2, 3))                             # (N, C)
    h = jnp.maximum(pooled @ w1t + b1, 0.0)                       # (N, Cr)
    s = jax.nn.sigmoid(h @ w2.T + b2)                             # (N, C)
    return x * s[:, :, None, None]


if __name__ == "__main__":
    key = jax.random.PRNGKey(0)

    # --- main config: module defaults (reduction=16), lane-aligned H*W ------
    N, C, H, W = 2, 64, 16, 16
    Cr = C // 16
    key, kx, k1, k2, k3, k4 = jax.random.split(key, 6)
    x = jax.random.normal(kx, (N, C, H, W), jnp.float32)
    w1t = jax.random.normal(k1, (C, Cr), jnp.float32) * 0.1
    b1 = jax.random.normal(k2, (Cr,), jnp.float32) * 0.1
    w2 = jax.random.normal(k3, (C, Cr), jnp.float32) * 0.1
    b2 = jax.random.normal(k4, (C,), jnp.float32) * 0.1

    ref = _ref_ca_layer(x, w1t, b1, w2, b2)

    # Auto path: batch folded into a single block (best for v5e/v6e).
    out_fold = jax.block_until_ready(
        jax.jit(ca_layer)(x, w1t, b1, w2, b2))
    assert out_fold.shape == (N, C, H, W)
    err = float(jnp.max(jnp.abs(out_fold - ref)))
    assert err < 1e-5, f"folded-batch path mismatch vs reference: {err}"

    # Explicit batch-grid path (v7x megacore sharding when N > 1).
    out_grid = jax.block_until_ready(
        jax.jit(functools.partial(ca_layer, batch_grid=True))(x, w1t, b1, w2, b2))
    err = float(jnp.max(jnp.abs(out_grid - ref)))
    assert err < 1e-5, f"batch-grid path mismatch vs reference: {err}"

    # --- odd spatial size: exercises the lane-padding guard -----------------
    N2, C2, H2, W2 = 1, 32, 10, 10
    Cr2 = C2 // 16
    key, kx, k1, k2, k3, k4 = jax.random.split(key, 6)
    x2 = jax.random.normal(kx, (N2, C2, H2, W2), jnp.float32)
    w1t2 = jax.random.normal(k1, (C2, Cr2), jnp.float32) * 0.1
    b12 = jax.random.normal(k2, (Cr2,), jnp.float32) * 0.1
    w22 = jax.random.normal(k3, (C2, Cr2), jnp.float32) * 0.1
    b22 = jax.random.normal(k4, (C2,), jnp.float32) * 0.1

    out_pad = jax.block_until_ready(
        jax.jit(ca_layer)(x2, w1t2, b12, w22, b22))
    ref_pad = _ref_ca_layer(x2, w1t2, b12, w22, b22)
    err = float(jnp.max(jnp.abs(out_pad - ref_pad)))
    assert out_pad.shape == (N2, C2, H2, W2)
    assert err < 1e-5, f"padded-HW path mismatch vs reference: {err}"

    print("KERNEL_OK")
</pallas_src>

<mosaic_0001>
module attributes {stable_mosaic.version = 11 : i64} {
  func.func @ca_kernel(%arg0: i32, %arg1: memref<2x64x256xf32, #tpu.memory_space<vmem>>, %arg2: memref<64x4xf32, #tpu.memory_space<vmem>>, %arg3: memref<1x4xf32, #tpu.memory_space<vmem>>, %arg4: memref<64x4xf32, #tpu.memory_space<vmem>>, %arg5: memref<64x1xf32, #tpu.memory_space<vmem>>, %arg6: memref<2x64x256xf32, #tpu.memory_space<vmem>>) attributes {dimension_semantics = [#tpu.dimension_semantics<arbitrary>], iteration_bounds = array<i64: 1>, scalar_prefetch = 0 : i64, scratch_operands = 0 : i64, tpu.core_type = #tpu.core_type<tc>, window_params = [{pipeline_mode = #tpu.pipeline_mode<synchronous>, transform_indices = @transform_0, window_bounds = array<i64: 2, 64, 256>}, {pipeline_mode = #tpu.pipeline_mode<synchronous>, transform_indices = @transform_1, window_bounds = array<i64: 64, 4>}, {pipeline_mode = #tpu.pipeline_mode<synchronous>, transform_indices = @transform_2, window_bounds = array<i64: 1, 4>}, {pipeline_mode = #tpu.pipeline_mode<synchronous>, transform_indices = @transform_3, window_bounds = array<i64: 64, 4>}, {pipeline_mode = #tpu.pipeline_mode<synchronous>, transform_indices = @transform_4, window_bounds = array<i64: 64, 1>}, {pipeline_mode = #tpu.pipeline_mode<synchronous>, transform_indices = @transform_5, window_bounds = array<i64: 2, 64, 256>}]} {
    %c0 = arith.constant 0 : index
    %c0_0 = arith.constant 0 : index
    %c0_1 = arith.constant 0 : index
    %0 = vector.load %arg1[%c0, %c0_0, %c0_1] : memref<2x64x256xf32, #tpu.memory_space<vmem>>, vector<1x64x256xf32>
    %1 = vector.shape_cast %0 : vector<1x64x256xf32> to vector<64x256xf32>
    %cst = arith.constant dense<0.000000e+00> : vector<64xf32>
    %2 = vector.multi_reduction <add>, %1, %cst [1] : vector<64x256xf32> to vector<64xf32>
    %3 = vector.shape_cast %2 : vector<64xf32> to vector<64x1xf32>
    %cst_2 = arith.constant 3.906250e-03 : f32
    %4 = vector.broadcast %cst_2 : f32 to vector<64x1xf32>
    %5 = arith.mulf %3, %4 : vector<64x1xf32>
    %c0_3 = arith.constant 0 : index
    %c0_4 = arith.constant 0 : index
    %6 = vector.load %arg2[%c0_3, %c0_4] : memref<64x4xf32, #tpu.memory_space<vmem>>, vector<64x4xf32>
    %7 = vector.broadcast %5 : vector<64x1xf32> to vector<64x4xf32>
    %8 = arith.mulf %6, %7 : vector<64x4xf32>
    %cst_5 = arith.constant dense<0.000000e+00> : vector<4xf32>
    %9 = vector.multi_reduction <add>, %8, %cst_5 [0] : vector<64x4xf32> to vector<4xf32>
    %10 = vector.shape_cast %9 : vector<4xf32> to vector<1x4xf32>
    %c0_6 = arith.constant 0 : index
    %c0_7 = arith.constant 0 : index
    %11 = vector.load %arg3[%c0_6, %c0_7] : memref<1x4xf32, #tpu.memory_space<vmem>>, vector<1x4xf32>
    %12 = arith.addf %10, %11 : vector<1x4xf32>
    %cst_8 = arith.constant 0.000000e+00 : f32
    %13 = vector.broadcast %cst_8 : f32 to vector<1x4xf32>
    %14 = arith.maximumf %12, %13 : vector<1x4xf32>
    %c0_9 = arith.constant 0 : index
    %c0_10 = arith.constant 0 : index
    %15 = vector.load %arg4[%c0_9, %c0_10] : memref<64x4xf32, #tpu.memory_space<vmem>>, vector<64x4xf32>
    %16 = vector.broadcast %14 : vector<1x4xf32> to vector<64x4xf32>
    %17 = arith.mulf %15, %16 : vector<64x4xf32>
    %cst_11 = arith.constant dense<0.000000e+00> : vector<64xf32>
    %18 = vector.multi_reduction <add>, %17, %cst_11 [1] : vector<64x4xf32> to vector<64xf32>
    %19 = vector.shape_cast %18 : vector<64xf32> to vector<64x1xf32>
    %c0_12 = arith.constant 0 : index
    %c0_13 = arith.constant 0 : index
    %20 = vector.load %arg5[%c0_12, %c0_13] : memref<64x1xf32, #tpu.memory_space<vmem>>, vector<64x1xf32>
    %21 = arith.addf %19, %20 : vector<64x1xf32>
    %22 = arith.negf %21 : vector<64x1xf32>
    %23 = math.exp %22 : vector<64x1xf32>
    %cst_14 = arith.constant 1.000000e+00 : f32
    %24 = vector.broadcast %cst_14 : f32 to vector<64x1xf32>
    %25 = arith.addf %24, %23 : vector<64x1xf32>
    %26 = arith.divf %24, %25 : vector<64x1xf32>
    %c0_15 = arith.constant 0 : index
    %c0_16 = arith.constant 0 : index
    %c0_17 = arith.constant 0 : index
    %27 = vector.load %arg1[%c0_15, %c0_16, %c0_17] : memref<2x64x256xf32, #tpu.memory_space<vmem>>, vector<1x64x256xf32>
    %28 = vector.shape_cast %27 : vector<1x64x256xf32> to vector<64x256xf32>
    %29 = vector.broadcast %26 : vector<64x1xf32> to vector<64x256xf32>
    %30 = arith.mulf %28, %29 : vector<64x256xf32>
    %c0_18 = arith.constant 0 : index
    %c0_19 = arith.constant 0 : index
    %c0_20 = arith.constant 0 : index
    %31 = vector.load %arg6[%c0_18, %c0_19, %c0_20] : memref<2x64x256xf32, #tpu.memory_space<vmem>>, vector<1x64x256xf32>
    %32 = vector.shape_cast %31 : vector<1x64x256xf32> to vector<64x256xf32>
    %33 = vector.shape_cast %30 : vector<64x256xf32> to vector<1x64x256xf32>
    tpu.vector_store %arg6[%c0_18, %c0_19, %c0_20], %33 {strides = array<i32>} : memref<2x64x256xf32, #tpu.memory_space<vmem>>, vector<1x64x256xf32>,
    %c1 = arith.constant 1 : index
    %c0_21 = arith.constant 0 : index
    %c0_22 = arith.constant 0 : index
    %34 = vector.load %arg1[%c1, %c0_21, %c0_22] : memref<2x64x256xf32, #tpu.memory_space<vmem>>, vector<1x64x256xf32>
    %35 = vector.shape_cast %34 : vector<1x64x256xf32> to vector<64x256xf32>
    %cst_23 = arith.constant dense<0.000000e+00> : vector<64xf32>
    %36 = vector.multi_reduction <add>, %35, %cst_23 [1] : vector<64x256xf32> to vector<64xf32>
    %37 = vector.shape_cast %36 : vector<64xf32> to vector<64x1xf32>
    %cst_24 = arith.constant 3.906250e-03 : f32
    %38 = vector.broadcast %cst_24 : f32 to vector<64x1xf32>
    %39 = arith.mulf %37, %38 : vector<64x1xf32>
    %c0_25 = arith.constant 0 : index
    %c0_26 = arith.constant 0 : index
    %40 = vector.load %arg2[%c0_25, %c0_26] : memref<64x4xf32, #tpu.memory_space<vmem>>, vector<64x4xf32>
    %41 = vector.broadcast %39 : vector<64x1xf32> to vector<64x4xf32>
    %42 = arith.mulf %40, %41 : vector<64x4xf32>
    %cst_27 = arith.constant dense<0.000000e+00> : vector<4xf32>
    %43 = vector.multi_reduction <add>, %42, %cst_27 [0] : vector<64x4xf32> to vector<4xf32>
    %44 = vector.shape_cast %43 : vector<4xf32> to vector<1x4xf32>
    %c0_28 = arith.constant 0 : index
    %c0_29 = arith.constant 0 : index
    %45 = vector.load %arg3[%c0_28, %c0_29] : memref<1x4xf32, #tpu.memory_space<vmem>>, vector<1x4xf32>
    %46 = arith.addf %44, %45 : vector<1x4xf32>
    %cst_30 = arith.constant 0.000000e+00 : f32
    %47 = vector.broadcast %cst_30 : f32 to vector<1x4xf32>
    %48 = arith.maximumf %46, %47 : vector<1x4xf32>
    %c0_31 = arith.constant 0 : index
    %c0_32 = arith.constant 0 : index
    %49 = vector.load %arg4[%c0_31, %c0_32] : memref<64x4xf32, #tpu.memory_space<vmem>>, vector<64x4xf32>
    %50 = vector.broadcast %48 : vector<1x4xf32> to vector<64x4xf32>
    %51 = arith.mulf %49, %50 : vector<64x4xf32>
    %cst_33 = arith.constant dense<0.000000e+00> : vector<64xf32>
    %52 = vector.multi_reduction <add>, %51, %cst_33 [1] : vector<64x4xf32> to vector<64xf32>
    %53 = vector.shape_cast %52 : vector<64xf32> to vector<64x1xf32>
    %c0_34 = arith.constant 0 : index
    %c0_35 = arith.constant 0 : index
    %54 = vector.load %arg5[%c0_34, %c0_35] : memref<64x1xf32, #tpu.memory_space<vmem>>, vector<64x1xf32>
    %55 = arith.addf %53, %54 : vector<64x1xf32>
    %56 = arith.negf %55 : vector<64x1xf32>
    %57 = math.exp %56 : vector<64x1xf32>
    %cst_36 = arith.constant 1.000000e+00 : f32
    %58 = vector.broadcast %cst_36 : f32 to vector<64x1xf32>
    %59 = arith.addf %58, %57 : vector<64x1xf32>
    %60 = arith.divf %58, %59 : vector<64x1xf32>
    %c1_37 = arith.constant 1 : index
    %c0_38 = arith.constant 0 : index
    %c0_39 = arith.constant 0 : index
    %61 = vector.load %arg1[%c1_37, %c0_38, %c0_39] : memref<2x64x256xf32, #tpu.memory_space<vmem>>, vector<1x64x256xf32>
    %62 = vector.shape_cast %61 : vector<1x64x256xf32> to vector<64x256xf32>
    %63 = vector.broadcast %60 : vector<64x1xf32> to vector<64x256xf32>
    %64 = arith.mulf %62, %63 : vector<64x256xf32>
    %c1_40 = arith.constant 1 : index
    %c0_41 = arith.constant 0 : index
    %c0_42 = arith.constant 0 : index
    %65 = vector.load %arg6[%c1_40, %c0_41, %c0_42] : memref<2x64x256xf32, #tpu.memory_space<vmem>>, vector<1x64x256xf32>
    %66 = vector.shape_cast %65 : vector<1x64x256xf32> to vector<64x256xf32>
    %67 = vector.shape_cast %64 : vector<64x256xf32> to vector<1x64x256xf32>
    tpu.vector_store %arg6[%c1_40, %c0_41, %c0_42], %67 {strides = array<i32>} : memref<2x64x256xf32, #tpu.memory_space<vmem>>, vector<1x64x256xf32>,
    return
  }
  func.func @transform_0(%arg0: i32) -> (i32, i32, i32) {
    %c0_i32 = arith.constant 0 : i32
    %c0_i32_0 = arith.constant 0 : i32
    %c0_i32_1 = arith.constant 0 : i32
    %c0_i32_2 = arith.constant 0 : i32
    return %c0_i32, %c0_i32_0, %c0_i32_1 : i32, i32, i32
  }
  func.func @transform_1(%arg0: i32) -> (i32, i32) {
    %c0_i32 = arith.constant 0 : i32
    %c0_i32_0 = arith.constant 0 : i32
    %c0_i32_1 = arith.constant 0 : i32
    return %c0_i32, %c0_i32_0 : i32, i32
  }
  func.func @transform_2(%arg0: i32) -> (i32, i32) {
    %c0_i32 = arith.constant 0 : i32
    %c0_i32_0 = arith.constant 0 : i32
    %c0_i32_1 = arith.constant 0 : i32
    return %c0_i32, %c0_i32_0 : i32, i32
  }
  func.func @transform_3(%arg0: i32) -> (i32, i32) {
    %c0_i32 = arith.constant 0 : i32
    %c0_i32_0 = arith.constant 0 : i32
    %c0_i32_1 = arith.constant 0 : i32
    return %c0_i32, %c0_i32_0 : i32, i32
  }
  func.func @transform_4(%arg0: i32) -> (i32, i32) {
    %c0_i32 = arith.constant 0 : i32
    %c0_i32_0 = arith.constant 0 : i32
    %c0_i32_1 = arith.constant 0 : i32
    return %c0_i32, %c0_i32_0 : i32, i32
  }
  func.func @transform_5(%arg0: i32) -> (i32, i32, i32) {
    %c0_i32 = arith.constant 0 : i32
    %c0_i32_0 = arith.constant 0 : i32
    %c0_i32_1 = arith.constant 0 : i32
    %c0_i32_2 = arith.constant 0 : i32
    return %c0_i32, %c0_i32_0, %c0_i32_1 : i32, i32, i32
  }
}

</mosaic_0001>

<bundles_post_ra>
// kernel: ca_layer.1
= control target key start
LH: loop header
LB: loop body
LE: loop exit
PB: predicated region body
PF: predicated region fallthrough
CT: control target
= control target key end

     0   :  { %vm84_vm0 = vcmask 31744   ;;  %s1143_s0 = inlined_call_operand.vmem [shape: f32[2,64,256], index: 0, kind: input, shape index: {}]   ;;  %s1144_s1 = inlined_call_operand.vmem [shape: f32[64,4], index: 1, kind: input, shape index: {}]   ;;  %s1145_s2 = inlined_call_operand.vmem [shape: f32[1,4], index: 2, kind: input, shape index: {}]   ;;  %s1146_s3 = inlined_call_operand.vmem [shape: f32[64,4], index: 3, kind: input, shape index: {}]   ;;  %s1147_s4 = inlined_call_operand.vmem [shape: f32[64,1], index: 4, kind: input, shape index: {}]   ;;  %s1148_s5 = inlined_call_operand.vmem [shape: f32[2,64,256], index: 5, kind: output, shape index: {}]  }
   0x1   :  { %v712_v0 = vld [vmem:[%s1143_s0] sm:$0xff]  ;;  %v717_v1 = vld [vmem:[%s1143_s0 + $0x8] sm:$0xff]  ;;  %v722_v2 = vld [vmem:[%s1143_s0 + $0x10] sm:$0xff] }
   0x2   :  { %v36_v3 = vadd.f32 %v717_v1, %v712_v0  ;;  %v729_v4 = vld [vmem:[%s1143_s0 + $0x18] sm:$0xff]  ;;  %v734_v5 = vld [vmem:[%s1143_s0 + $0x80] sm:$0xff]  ;;  %v739_v6 = vld [vmem:[%s1143_s0 + $0x88] sm:$0xff] }
   0x3   :  { %v306_v7 = vadd.f32 %v739_v6, %v734_v5  ;;  %v746_v8 = vld [vmem:[%s1143_s0 + $0x90] sm:$0xff]  ;;  %v39_v9 = vadd.f32 %v729_v4, %v722_v2  ;;  %v753_v10 = vld [vmem:[%s1143_s0 + $0x98] sm:$0xff]  ;;  %v758_v11 = vld [vmem:[%s1143_s0 + $0x20] sm:$0xff] }
   0x4   :  { %37 = vadd.xlane.f32.xlu0 %v36_v3  ;;  %v763_v12 = vld [vmem:[%s1143_s0 + $0x28] sm:$0xff]  ;;  %v309_v13 = vadd.f32 %v753_v10, %v746_v8  ;;  %v770_v14 = vld [vmem:[%s1143_s0 + $0xa0] sm:$0xff]  ;;  %v782_v17 = vld [vmem:[%s1143_s0 + $0x30] sm:$0xff] }
   0x5   :  { %307 = vadd.xlane.f32.xlu1 %v306_v7  ;;  %v775_v15 = vld [vmem:[%s1143_s0 + $0xa8] sm:$0xff]  ;;  %v42_v16 = vadd.f32 %v763_v12, %v758_v11  ;;  %v787_v18 = vld [vmem:[%s1143_s0 + $0x38] sm:$0xff]  ;;  %v794_v20 = vld [vmem:[%s1143_s0 + $0xb0] sm:$0xff] }
   0x6   :  { %v312_v19 = vadd.f32 %v775_v15, %v770_v14  ;;  %v799_v21 = vld [vmem:[%s1143_s0 + $0xb8] sm:$0xff]  ;;  %v45_v22 = vadd.f32 %v787_v18, %v782_v17  ;;  %v806_v23 = vld [vmem:[%s1143_s0 + $0x40] sm:$0xff]  ;;  %v811_v24 = vld [vmem:[%s1143_s0 + $0x48] sm:$0xff] }
   0x7   :  { %v315_v25 = vadd.f32 %v799_v21, %v794_v20  ;;  %v818_v26 = vld [vmem:[%s1143_s0 + $0xc0] sm:$0xff]  ;;  %v823_v27 = vld [vmem:[%s1143_s0 + $0xc8] sm:$0xff]  ;;  %v48_v28 = vadd.f32 %v811_v24, %v806_v23  ;;  %v830_v29 = vld [vmem:[%s1143_s0 + $0x50] sm:$0xff] }
   0x8   :  { %40 = vadd.xlane.f32.xlu0 %v39_v9  ;;  %v835_v30 = vld [vmem:[%s1143_s0 + $0x58] sm:$0xff]  ;;  %v318_v31 = vadd.f32 %v823_v27, %v818_v26  ;;  %v842_v32 = vld [vmem:[%s1143_s0 + $0xd0] sm:$0xff]  ;;  %v854_v35 = vld [vmem:[%s1143_s0 + $0x60] sm:$0xff] }
   0x9   :  { %310 = vadd.xlane.f32.xlu1 %v309_v13  ;;  %v847_v33 = vld [vmem:[%s1143_s0 + $0xd8] sm:$0xff]  ;;  %v51_v34 = vadd.f32 %v835_v30, %v830_v29  ;;  %v859_v36 = vld [vmem:[%s1143_s0 + $0x68] sm:$0xff]  ;;  %v866_v38 = vld [vmem:[%s1143_s0 + $0xe0] sm:$0xff] }
   0xa   :  { %v321_v37 = vadd.f32 %v847_v33, %v842_v32  ;;  %v871_v39 = vld [vmem:[%s1143_s0 + $0xe8] sm:$0xff]  ;;  %v54_v40 = vadd.f32 %v859_v36, %v854_v35  ;;  %v878_v41 = vld [vmem:[%s1143_s0 + $0x70] sm:$0xff]  ;;  %v883_v42 = vld [vmem:[%s1143_s0 + $0x78] sm:$0xff] }
   0xb   :  { %v324_v43 = vadd.f32 %v871_v39, %v866_v38  ;;  %v890_v44 = vld [vmem:[%s1143_s0 + $0xf0] sm:$0xff]  ;;  %v895_v45 = vld [vmem:[%s1143_s0 + $0xf8] sm:$0xff]  ;;  %v57_v46 = vadd.f32 %v883_v42, %v878_v41  ;;  %v68_v51 = vld [vmem:[%s1144_s1] sm:$0xff] }
   0xc   :  { %43 = vadd.xlane.f32.xlu0 %v42_v16  ;;  %v327_v47 = vadd.f32 %v895_v45, %v890_v44  ;;  %v69_v56 = vld [vmem:[%s1144_s1 + $0x8] sm:$0xff]  ;;  %v70_v3 = vld [vmem:[%s1144_s1 + $0x10] sm:$0xff] }
   0xd   :  { %313 = vadd.xlane.f32.xlu1 %v312_v19 }
  0x10   :  { %46 = vadd.xlane.f32.xlu0 %v45_v22 }
  0x11   :  { %316 = vadd.xlane.f32.xlu1 %v315_v25 }
  0x14   :  { %49 = vadd.xlane.f32.xlu0 %v48_v28 }
  0x15   :  { %319 = vadd.xlane.f32.xlu1 %v318_v31 }
  0x18   :  { %52 = vadd.xlane.f32.xlu0 %v51_v34  ;;  %v71_v34 = vld [vmem:[%s1144_s1 + $0x18] sm:$0xff] }
  0x19   :  { %322 = vadd.xlane.f32.xlu1 %v321_v37 }
  0x1c   :  { %55 = vadd.xlane.f32.xlu0 %v54_v40 }
  0x1d   :  { %325 = vadd.xlane.f32.xlu1 %v324_v43 }
  0x20   :  { %58 = vadd.xlane.f32.xlu0 %v57_v46 }
  0x21   :  { %328 = vadd.xlane.f32.xlu1 %v327_v47 }
  0x91   :  { %v38_v48 = vpop.xlane.xlu0 %37 }
  0x92   :  { %v308_v49 = vpop.xlane.xlu1 %307  ;;  %v60_v16 = vmul.f32 0.00390625, %v38_v48  ;;  %v72_v48 = vld [vmem:[%s1144_s1 + $0x20] sm:$0xff] }
  0x93   :  { %v330_v50 = vmul.f32 0.00390625, %v308_v49 }
  0x94   :  { %v76_v47 = vmul.f32 %v68_v51, %v60_v16 }
  0x95   :  { %v41_v52 = vpop.xlane.xlu0 %40  ;;  %v346_v53 = vmul.f32 %v330_v50, %v68_v51 }
  0x96   :  { %v311_v54 = vpop.xlane.xlu1 %310  ;;  %v61_v63 = vmul.f32 0.00390625, %v41_v52 }
  0x97   :  { %v331_v55 = vmul.f32 0.00390625, %v311_v54  ;;  %v354_v57 = vsel %vm84_vm0, %v346_v53, 0.0 }
  0x98   :  { %v77_v31 = vmul.f32 %v69_v56, %v61_v63 }
  0x99   :  { %v44_v58 = vpop.xlane.xlu0 %43  ;;  %v347_v59 = vmul.f32 %v331_v55, %v69_v56 }
  0x9a   :  { %v314_v60 = vpop.xlane.xlu1 %313  ;;  %v62_v19 = vmul.f32 0.00390625, %v44_v58  ;;  %v86_v55 = vsel %vm84_vm0, %v77_v31, 0.0  ;;  %v73_v58 = vld [vmem:[%s1144_s1 + $0x28] sm:$0xff] }
  0x9b   :  { %v355_v61 = vsel %vm84_vm0, %v347_v59, 0.0  ;;  %v332_v62 = vmul.f32 0.00390625, %v314_v60  ;;  %v85_v60 = vsel %vm84_vm0, %v76_v47, 0.0 }
  0x9c   :  { %v356_v7 = vadd.f32 %v355_v61, %v354_v57  ;;  %v78_v49 = vmul.f32 %v70_v3, %v62_v19 }
  0x9d   :  { %v47_v9 = vpop.xlane.xlu0 %46  ;;  %v348_v13 = vmul.f32 %v332_v62, %v70_v3 }
  0x9e   :  { %v317_v22 = vpop.xlane.xlu1 %316  ;;  %v63_v37 = vmul.f32 0.00390625, %v47_v9  ;;  %v88_v61 = vsel %vm84_vm0, %v78_v49, 0.0 }
  0x9f   :  { %v357_v25 = vsel %vm84_vm0, %v348_v13, 0.0  ;;  %v333_v28 = vmul.f32 0.00390625, %v317_v22 }
  0xa0   :  { %v358_v40 = vadd.f32 %v357_v25, %v356_v7  ;;  %v79_v56 = vmul.f32 %v71_v34, %v63_v37  ;;  %v87_v7 = vadd.f32 %v86_v55, %v85_v60 }
  0xa1   :  { %v50_v43 = vpop.xlane.xlu0 %49  ;;  %v349_v46 = vmul.f32 %v333_v28, %v71_v34  ;;  %v74_v28 = vld [vmem:[%s1144_s1 + $0x30] sm:$0xff] }
  0xa2   :  { %v64_v50 = vmul.f32 0.00390625, %v50_v43  ;;  %v320_v52 = vpop.xlane.xlu1 %319  ;;  %v90_v16 = vsel %vm84_vm0, %v79_v56, 0.0  ;;  %v89_v25 = vadd.f32 %v88_v61, %v87_v7 }
  0xa3   :  { %v359_v53 = vsel %vm84_vm0, %v349_v46, 0.0  ;;  %v334_v54 = vmul.f32 0.00390625, %v320_v52 }
  0xa4   :  { %v360_v57 = vadd.f32 %v359_v53, %v358_v40  ;;  %v80_v62 = vmul.f32 %v72_v48, %v64_v50  ;;  %v91_v46 = vadd.f32 %v90_v16, %v89_v25 }
  0xa5   :  { %v53_v59 = vpop.xlane.xlu0 %52  ;;  %v350_v51 = vmul.f32 %v334_v54, %v72_v48  ;;  %v75_v54 = vld [vmem:[%s1144_s1 + $0x38] sm:$0xff] }
  0xa6   :  { %v65_v63 = vmul.f32 0.00390625, %v53_v59  ;;  %v323_v3 = vpop.xlane.xlu1 %322  ;;  %v92_v37 = vsel %vm84_vm0, %v80_v62, 0.0 }
  0xa7   :  { %v361_v9 = vsel %vm84_vm0, %v350_v51, 0.0  ;;  %v335_v13 = vmul.f32 0.00390625, %v323_v3  ;;  %v93_v53 = vadd.f32 %v92_v37, %v91_v46 }
  0xa8   :  { %v81_v19 = vmul.f32 %v73_v58, %v65_v63  ;;  %v362_v22 = vadd.f32 %v361_v9, %v360_v57 }
  0xa9   :  { %v56_v31 = vpop.xlane.xlu0 %55  ;;  %v351_v34 = vmul.f32 %v335_v13, %v73_v58 }
  0xaa   :  { %v66_v40 = vmul.f32 0.00390625, %v56_v31  ;;  %v326_v43 = vpop.xlane.xlu1 %325  ;;  %v94_v50 = vsel %vm84_vm0, %v81_v19, 0.0 }
  0xab   :  { %v363_v47 = vsel %vm84_vm0, %v351_v34, 0.0  ;;  %v336_v49 = vmul.f32 0.00390625, %v326_v43  ;;  %v95_v51 = vadd.f32 %v94_v50, %v93_v53  ;;  %v117_v34 = vlaneseq  ;;  %v106_v50 = vld [vmem:[%s1145_s2] sm:$0x1] }
  0xac   :  { %v82_v52 = vmul.f32 %v74_v28, %v66_v40  ;;  %v364_v48 = vadd.f32 %v363_v47, %v362_v22 }
  0xad   :  { %v59_v55 = vpop.xlane.xlu0 %58  ;;  %v352_v56 = vmul.f32 %v336_v49, %v74_v28  ;;  %v118_v47 = vshrl.u32 %v117_v34, 7 }
  0xae   :  { %v96_v57 = vsel %vm84_vm0, %v82_v52, 0.0  ;;  %v67_v58 = vmul.f32 0.00390625, %v59_v55  ;;  %v329_v59 = vpop.xlane.xlu1 %328 }
  0xaf   :  { %v365_v60 = vsel %vm84_vm0, %v352_v56, 0.0  ;;  %v337_v61 = vmul.f32 0.00390625, %v329_v59  ;;  %v97_v3 = vadd.f32 %v96_v57, %v95_v51  ;;  %v119_v53 = vsub.s32 0, %v118_v47  ;;  %v110_v57 = vld [vmem:[%s1146_s3 + $0x8] sm:$0xff]  ;;  %v375_v51 = vld [vmem:[%s1145_s2] sm:$0x1] }
  0xb0   :  { %v83_v62 = vmul.f32 %v75_v54, %v67_v58  ;;  %v366_v63 = vadd.f32 %v365_v60, %v364_v48  ;;  %v109_v58 = vld [vmem:[%s1146_s3] sm:$0xff]  ;;  %v112_v60 = vld [vmem:[%s1146_s3 + $0x18] sm:$0xff] }
  0xb1   :  { %v353_v7 = vmul.f32 %v337_v61, %v75_v54  ;;  %v111_v61 = vld [vmem:[%s1146_s3 + $0x10] sm:$0xff] }
  0xb2   :  { %v98_v9 = vsel %vm84_vm0, %v83_v62, 0.0 }
  0xb3   :  { %v99_v13 = vadd.f32 %v98_v9, %v97_v3  ;;  %v367_v16 = vsel %vm84_vm0, %v353_v7, 0.0 }
  0xb4   :  { %v368_v19 = vadd.f32 %v367_v16, %v366_v63 }
  0xb5   :  { %v100_v22 = vrot.slane %v99_v13, 4 }
  0xb6   :  { %v369_v25 = vrot.slane %v368_v19, 4 }
  0xb7   :  { %v101_v28 = vadd.f32 %v100_v22, %v99_v13  ;;  %v113_v22 = vld [vmem:[%s1146_s3 + $0x20] sm:$0xff] }
  0xb8   :  { %v370_v31 = vadd.f32 %v369_v25, %v368_v19  ;;  %v114_v19 = vld [vmem:[%s1146_s3 + $0x28] sm:$0xff] }
  0xb9   :  { %v102_v37 = vrot.slane %v101_v28, 2 }
  0xba   :  { %v371_v40 = vrot.slane %v370_v31, 2 }
  0xbb   :  { %v103_v43 = vadd.f32 %v102_v37, %v101_v28 }
  0xbc   :  { %v372_v46 = vadd.f32 %v371_v40, %v370_v31  ;;  %v116_v40 = vld [vmem:[%s1146_s3 + $0x38] sm:$0xff] }
  0xbd   :  { %v104_v49 = vrot.slane %v103_v43, 1 }
  0xbe   :  { %v373_v48 = vrot.slane %v372_v46, 1 }
  0xbf   :  { %v105_v52 = vadd.f32 %v104_v49, %v103_v43  ;;  %v115_v43 = vld [vmem:[%s1146_s3 + $0x30] sm:$0xff] }
  0xc0   :  { %v374_v56 = vadd.f32 %v373_v48, %v372_v46 }
  0xc1   :  { %v107_v54 = vadd.f32 %v106_v50, %v105_v52 }
  0xc2   :  { %v376_v3 = vadd.f32 %v375_v51, %v374_v56 }
  0xc3   :  { %v108_v55 = vmax.f32 %v107_v54, 0.0 }
  0xc4   :  { %v377_v25 = vmax.f32 %v376_v3, 0.0 }
  0xc5   :  { %v120_v59 = vrot.slane %v108_v55, %v119_v53 }
  0xc6   :  { %v389_v46 = vrot.slane %v377_v25, %v119_v53  ;;  %v678_v25 = vmov 0  }
  0xc7   :  { %v122_v62 = vmul.f32 %v120_v59, %v110_v57  ;;  %v121_v63 = vmul.f32 %v120_v59, %v109_v58  ;;  %v124_v13 = vmul.f32 %v120_v59, %v112_v60  ;;  %v123_v16 = vmul.f32 %v120_v59, %v111_v61  ;;  %613 = vset.pattern.permute.xlu1 %v678_v25 }
  0xc8   :  { %v126_v34 = vmul.f32 %v120_v59, %v114_v19  ;;  %v125_v37 = vmul.f32 %v120_v59, %v113_v22  ;;  %v128_v50 = vmul.f32 %v120_v59, %v116_v40  ;;  %v127_v52 = vmul.f32 %v120_v59, %v115_v43  ;;  %612 = vset.pattern.permute.xlu0 %v678_v25 }
  0xc9   :  { %v132_v7 = vsel %vm84_vm0, %v122_v62, 0.0  ;;  %v129_v9 = vsel %vm84_vm0, %v121_v63, 0.0  ;;  %v138_v28 = vsel %vm84_vm0, %v124_v13, 0.0  ;;  %v135_v31 = vsel %vm84_vm0, %v123_v16, 0.0 }
  0xca   :  { %133 = vadd.xlane.f32.xlu1 %v132_v7  ;;  %130 = vadd.xlane.f32.xlu0 %v129_v9  ;;  %v144_v47 = vsel %vm84_vm0, %v126_v34, 0.0  ;;  %v141_v49 = vsel %vm84_vm0, %v125_v37, 0.0  ;;  %v150_v48 = vsel %vm84_vm0, %v128_v50, 0.0  ;;  %v147_v54 = vsel %vm84_vm0, %v127_v52, 0.0 }
  0xcb   :  { %v391_v55 = vmul.f32 %v389_v46, %v110_v57  ;;  %v390_v56 = vmul.f32 %v389_v46, %v109_v58  ;;  %v393_v62 = vmul.f32 %v389_v46, %v112_v60  ;;  %v392_v63 = vmul.f32 %v389_v46, %v111_v61 }
  0xcc   :  { %v395_v7 = vmul.f32 %v389_v46, %v114_v19  ;;  %v394_v9 = vmul.f32 %v389_v46, %v113_v22  ;;  %v397_v13 = vmul.f32 %v389_v46, %v116_v40  ;;  %v396_v16 = vmul.f32 %v389_v46, %v115_v43  ;;  %v154_v19 = vld [vmem:[%s1147_s4 + $0x8] sm:$0xff]  ;;  %v153_v22 = vld [vmem:[%s1147_s4] sm:$0xff]  ;;  %v156_v40 = vld [vmem:[%s1147_s4 + $0x18] sm:$0xff] }
  0xcd   :  { %v401_v51 = vsel %vm84_vm0, %v391_v55, 0.0  ;;  %v398_v53 = vsel %vm84_vm0, %v390_v56, 0.0  ;;  %v407_v59 = vsel %vm84_vm0, %v393_v62, 0.0  ;;  %v404_v3 = vsel %vm84_vm0, %v392_v63, 0.0  ;;  %v155_v43 = vld [vmem:[%s1147_s4 + $0x10] sm:$0xff]  ;;  %v157_v55 = vld [vmem:[%s1147_s4 + $0x20] sm:$0xff] }
  0xce   :  { %139 = vadd.xlane.f32.xlu1 %v138_v28  ;;  %136 = vadd.xlane.f32.xlu0 %v135_v31  ;;  %v413_v57 = vsel %vm84_vm0, %v395_v7, 0.0  ;;  %v410_v58 = vsel %vm84_vm0, %v394_v9, 0.0  ;;  %v419_v60 = vsel %vm84_vm0, %v397_v13, 0.0  ;;  %v416_v61 = vsel %vm84_vm0, %v396_v16, 0.0  ;;  %v1008_v9 = vld [vmem:[%s1147_s4 + $0x30] sm:$0xff] }
  0xd2   :  { %145 = vadd.xlane.f32.xlu1 %v144_v47  ;;  %142 = vadd.xlane.f32.xlu0 %v141_v49 }
  0xd6   :  { %151 = vadd.xlane.f32.xlu1 %v150_v48  ;;  %148 = vadd.xlane.f32.xlu0 %v147_v54  ;;  %v158_v54 = vld [vmem:[%s1147_s4 + $0x28] sm:$0xff] }
  0xda   :  { %402 = vadd.xlane.f32.xlu1 %v401_v51  ;;  %399 = vadd.xlane.f32.xlu0 %v398_v53 }
  0xde   :  { %408 = vadd.xlane.f32.xlu1 %v407_v59  ;;  %405 = vadd.xlane.f32.xlu0 %v404_v3 }
  0xe2   :  { %414 = vadd.xlane.f32.xlu1 %v413_v57  ;;  %411 = vadd.xlane.f32.xlu0 %v410_v58 }
  0xe6   :  { %420 = vadd.xlane.f32.xlu1 %v419_v60  ;;  %417 = vadd.xlane.f32.xlu0 %v416_v61  ;;  %v160_v60 = vld [vmem:[%s1147_s4 + $0x38] sm:$0xff] }
 0x157   :  { %v134_v28 = vpop.xlane.xlu1 %133  ;;  %v131_v31 = vpop.xlane.xlu0 %130 }
 0x158   :  { %v162_v34 = vadd.f32 %v154_v19, %v134_v28  ;;  %v161_v37 = vadd.f32 %v153_v22, %v131_v31 }
 0x15a   :  { %v564_v46 = vmul.f32 -1.442695, %v162_v34  ;;  %v563_v47 = vmul.f32 -1.442695, %v161_v37 }
 0x15b   :  { %v140_v49 = vpop.xlane.xlu1 %139  ;;  %v137_v50 = vpop.xlane.xlu0 %136 }
 0x15c   :  { %614 = vpow2.f32 %v564_v46  ;;  %v164_v52 = vadd.f32 %v156_v40, %v140_v49  ;;  %v163_v48 = vadd.f32 %v155_v43, %v137_v50 }
 0x15d   :  { %616 = vpow2.f32 %v563_v47 }
 0x15e   :  { %v566_v56 = vmul.f32 -1.442695, %v164_v52  ;;  %v565_v51 = vmul.f32 -1.442695, %v163_v48 }
 0x15f   :  { %v146_v53 = vpop.xlane.xlu1 %145  ;;  %v143_v62 = vpop.xlane.xlu0 %142 }
 0x160   :  { %618 = vpow2.f32 %v566_v56  ;;  %v166_v63 = vadd.f32 %v158_v54, %v146_v53  ;;  %v165_v59 = vadd.f32 %v157_v55, %v143_v62 }
 0x161   :  { %620 = vpow2.f32 %v565_v51 }
 0x162   :  { %v568_v3 = vmul.f32 -1.442695, %v166_v63  ;;  %v567_v7 = vmul.f32 -1.442695, %v165_v59 }
 0x163   :  { %v152_v57 = vpop.xlane.xlu1 %151  ;;  %v149_v58 = vpop.xlane.xlu0 %148 }
 0x164   :  { %622 = vpow2.f32 %v567_v7  ;;  %v167_v13 = vadd.f32 %v1008_v9, %v149_v58  ;;  %v168_v46 = vadd.f32 %v160_v60, %v152_v57 }
 0x165   :  { %624 = vpow2.f32 %v568_v3 }
 0x166   :  { %v615_v16 = vpop.eup %614  ;;  %v569_v47 = vmul.f32 -1.442695, %v167_v13  ;;  %v570_v62 = vmul.f32 -1.442695, %v168_v46 }
 0x167   :  { %v617_v61 = vpop.eup %616  ;;  %v194_v25 = vadd.f32 1.0, %v615_v16  ;;  %v403_v28 = vpop.xlane.xlu1 %402 }
 0x168   :  { %v400_v31 = vpop.xlane.xlu0 %399  ;;  %v193_v34 = vadd.f32 1.0, %v617_v61  ;;  %v431_v37 = vadd.f32 %v403_v28, %v154_v19 }
 0x169   :  { %626 = vrcp.f32 %v194_v25  ;;  %v430_v63 = vadd.f32 %v400_v31, %v153_v22 }
 0x16a   :  { %v619_v49 = vpop.eup %618  ;;  %628 = vrcp.f32 %v193_v34  ;;  %v588_v50 = vmul.f32 -1.442695, %v431_v37 }
 0x16b   :  { %v621_v52 = vpop.eup %620  ;;  %v409_v48 = vpop.xlane.xlu1 %408  ;;  %v196_v59 = vadd.f32 1.0, %v619_v49  ;;  %v587_v61 = vmul.f32 -1.442695, %v430_v63 }
 0x16c   :  { %v406_v56 = vpop.xlane.xlu0 %405  ;;  %v195_v51 = vadd.f32 1.0, %v621_v52  ;;  %630 = vpow2.f32 %v588_v50  ;;  %v433_v53 = vadd.f32 %v409_v48, %v156_v40 }
 0x16d   :  { %632 = vpow2.f32 %v569_v47  ;;  %v432_v13 = vadd.f32 %v406_v56, %v155_v43 }
 0x16e   :  { %634 = vrcp.f32 %v195_v51  ;;  %v590_v3 = vmul.f32 -1.442695, %v433_v53  ;;  %v623_v7 = vpop.eup %622 }
 0x16f   :  { %v415_v19 = vpop.xlane.xlu1 %414  ;;  %v625_v57 = vpop.eup %624  ;;  %v197_v25 = vadd.f32 1.0, %v623_v7  ;;  %v589_v22 = vmul.f32 -1.442695, %v432_v13 }
 0x170   :  { %v412_v58 = vpop.xlane.xlu0 %411  ;;  %636 = vpow2.f32 %v590_v3  ;;  %v435_v16 = vadd.f32 %v415_v19, %v158_v54  ;;  %v198_v40 = vadd.f32 1.0, %v625_v57 }
 0x171   :  { %638 = vpow2.f32 %v570_v62  ;;  %v434_v31 = vadd.f32 %v412_v58, %v157_v55 }
 0x172   :  { %640 = vrcp.f32 %v196_v59  ;;  %v592_v28 = vmul.f32 -1.442695, %v435_v16 }
 0x173   :  { %v627_v34 = vpop.eup %626  ;;  %v421_v37 = vpop.xlane.xlu1 %420  ;;  %v591_v56 = vmul.f32 -1.442695, %v434_v31 }
 0x174   :  { %v629_v46 = vpop.eup %628  ;;  %642 = vpow2.f32 %v592_v28  ;;  %v437_v47 = vadd.f32 %v421_v37, %v160_v60  ;;  %224 = vperm.xlu1 %613, %v627_v34   ;;  %v418_v49 = vpop.xlane.xlu0 %417 }
 0x175   :  { %644 = vpow2.f32 %v587_v61  ;;  %219 = vperm.xlu0 %612, %v629_v46   ;;  %v436_v51 = vadd.f32 %v418_v49, %v1008_v9 }
 0x176   :  { %v631_v50 = vpop.eup %630  ;;  %646 = vrcp.f32 %v197_v25  ;;  %v594_v43 = vmul.f32 -1.442695, %v437_v47 }
 0x177   :  { %v633_v54 = vpop.eup %632  ;;  %648 = vrcp.f32 %v198_v40  ;;  %v463_v52 = vadd.f32 1.0, %v631_v50  ;;  %v593_v59 = vmul.f32 -1.442695, %v436_v51 }
 0x178   :  { %v635_v48 = vpop.eup %634  ;;  %650 = vpow2.f32 %v589_v22  ;;  %v199_v55 = vadd.f32 1.0, %v633_v54 }
 0x179   :  { %652 = vrcp.f32 %v463_v52  ;;  %229 = vperm.xlu1 %613, %v635_v48  }
 0x17a   :  { %v637_v53 = vpop.eup %636  ;;  %654 = vpow2.f32 %v594_v43 }
 0x17b   :  { %v639_v60 = vpop.eup %638  ;;  %v465_v62 = vadd.f32 1.0, %v637_v53  ;;  %656 = vpow2.f32 %v591_v56 }
 0x17c   :  { %v641_v63 = vpop.eup %640  ;;  %v200_v7 = vadd.f32 1.0, %v639_v60 }
 0x17d   :  { %658 = vrcp.f32 %v465_v62  ;;  %234 = vperm.xlu1 %613, %v641_v63  }
 0x17e   :  { %v643_v3 = vpop.eup %642  ;;  %660 = vrcp.f32 %v199_v55 }
 0x17f   :  { %v645_v19 = vpop.eup %644  ;;  %v467_v58 = vadd.f32 1.0, %v643_v3  ;;  %662 = vpow2.f32 %v593_v59 }
 0x180   :  { %v647_v57 = vpop.eup %646  ;;  %v462_v16 = vadd.f32 1.0, %v645_v19 }
 0x181   :  { %v649_v9 = vpop.eup %648  ;;  %664 = vrcp.f32 %v467_v58  ;;  %239 = vperm.xlu1 %613, %v647_v57  }
 0x182   :  { %v651_v13 = vpop.eup %650  ;;  %666 = vrcp.f32 %v200_v7 }
 0x183   :  { %v653_v61 = vpop.eup %652  ;;  %668 = vrcp.f32 %v462_v16  ;;  %v464_v40 = vadd.f32 1.0, %v651_v13 }
 0x184   :  { %v655_v25 = vpop.eup %654  ;;  %493 = vperm.xlu0 %612, %v653_v61  }
 0x185   :  { %v469_v28 = vadd.f32 1.0, %v655_v25  ;;  %244 = vperm.xlu1 %613, %v649_v9   ;;  %v657_v34 = vpop.eup %656 }
 0x186   :  { %v466_v31 = vadd.f32 1.0, %v657_v34 }
 0x187   :  { %v659_v37 = vpop.eup %658  ;;  %670 = vrcp.f32 %v469_v28 }
 0x188   :  { %v661_v46 = vpop.eup %660  ;;  %503 = vperm.xlu0 %612, %v659_v37   ;;  %672 = vrcp.f32 %v464_v40 }
 0x189   :  { %249 = vperm.xlu1 %613, %v661_v46   ;;  %v663_v22 = vpop.eup %662  ;;  %674 = vrcp.f32 %v466_v31 }
 0x18a   :  { %v468_v50 = vadd.f32 1.0, %v663_v22 }
 0x18b   :  { %v665_v47 = vpop.eup %664 }
 0x18c   :  { %v667_v49 = vpop.eup %666  ;;  %513 = vperm.xlu0 %612, %v665_v47   ;;  %676 = vrcp.f32 %v468_v50 }
 0x18d   :  { %254 = vperm.xlu1 %613, %v667_v49   ;;  %v669_v43 = vpop.eup %668 }
 0x191   :  { %v671_v54 = vpop.eup %670  ;;  %488 = vperm.xlu1 %613, %v669_v43  }
 0x192   :  { %523 = vperm.xlu0 %612, %v671_v54   ;;  %v673_v52 = vpop.eup %672 }
 0x193   :  { %v675_v48 = vpop.eup %674 }
 0x195   :  { %498 = vperm.xlu1 %613, %v673_v52  }
 0x196   :  { %v677_v56 = vpop.eup %676 }
 0x199   :  { %508 = vperm.xlu1 %613, %v675_v48  }
 0x19d   :  { %518 = vperm.xlu1 %613, %v677_v56  }
 0x1f3   :  { %v225_v51 = vpop.permute.xlu1 %224 }
 0x1f4   :  { %v259_v53 = vmul.f32 %v225_v51, %v722_v2  ;;  %v260_v55 = vmul.f32 %v225_v51, %v729_v4  ;;  %v220_v60 = vpop.permute.xlu0 %219 }
 0x1f5   :  { %v257_v62 = vmul.f32 %v220_v60, %v712_v0  ;;  %v258_v63 = vmul.f32 %v220_v60, %v717_v1 }
 0x1f6   :  { %275 = vst [vmem:[%s1148_s5 + $0x10] sm:$0xff] %v259_v53  ;;  %276 = vst [vmem:[%s1148_s5 + $0x18] sm:$0xff] %v260_v55 }
 0x1f7   :  { %273 = vst [vmem:[%s1148_s5] sm:$0xff] %v257_v62  ;;  %274 = vst [vmem:[%s1148_s5 + $0x8] sm:$0xff] %v258_v63 }
 0x1f8   :  { %v230_v2 = vpop.permute.xlu1 %229 }
 0x1f9   :  { %v261_v0 = vmul.f32 %v230_v2, %v758_v11  ;;  %v262_v1 = vmul.f32 %v230_v2, %v763_v12 }
 0x1fb   :  { %277 = vst [vmem:[%s1148_s5 + $0x20] sm:$0xff] %v261_v0  ;;  %278 = vst [vmem:[%s1148_s5 + $0x28] sm:$0xff] %v262_v1 }
 0x1fc   :  { %v235_v4 = vpop.permute.xlu1 %234 }
 0x1fd   :  { %v263_v59 = vmul.f32 %v235_v4, %v782_v17  ;;  %v264_v3 = vmul.f32 %v235_v4, %v787_v18 }
 0x1ff   :  { %279 = vst [vmem:[%s1148_s5 + $0x30] sm:$0xff] %v263_v59  ;;  %280 = vst [vmem:[%s1148_s5 + $0x38] sm:$0xff] %v264_v3 }
 0x200   :  { %v240_v11 = vpop.permute.xlu1 %239 }
 0x201   :  { %v265_v12 = vmul.f32 %v240_v11, %v806_v23  ;;  %v266_v7 = vmul.f32 %v240_v11, %v811_v24 }
 0x203   :  { %281 = vst [vmem:[%s1148_s5 + $0x40] sm:$0xff] %v265_v12  ;;  %282 = vst [vmem:[%s1148_s5 + $0x48] sm:$0xff] %v266_v7  ;;  %v494_v17 = vpop.permute.xlu0 %493 }
 0x204   :  { %v245_v18 = vpop.permute.xlu1 %244  ;;  %v528_v19 = vmul.f32 %v746_v8, %v494_v17  ;;  %v529_v58 = vmul.f32 %v753_v10, %v494_v17 }
 0x205   :  { %v267_v57 = vmul.f32 %v245_v18, %v830_v29  ;;  %v268_v23 = vmul.f32 %v245_v18, %v835_v30 }
 0x206   :  { %597 = vst [vmem:[%s1148_s5 + $0x90] sm:$0xff] %v528_v19  ;;  %598 = vst [vmem:[%s1148_s5 + $0x98] sm:$0xff] %v529_v58 }
 0x207   :  { %283 = vst [vmem:[%s1148_s5 + $0x50] sm:$0xff] %v267_v57  ;;  %284 = vst [vmem:[%s1148_s5 + $0x58] sm:$0xff] %v268_v23  ;;  %v504_v8 = vpop.permute.xlu0 %503 }
 0x208   :  { %v250_v10 = vpop.permute.xlu1 %249  ;;  %v532_v24 = vmul.f32 %v794_v20, %v504_v8  ;;  %v533_v29 = vmul.f32 %v799_v21, %v504_v8 }
 0x209   :  { %v269_v30 = vmul.f32 %v250_v10, %v854_v35  ;;  %v270_v9 = vmul.f32 %v250_v10, %v859_v36 }
 0x20a   :  { %601 = vst [vmem:[%s1148_s5 + $0xb0] sm:$0xff] %v532_v24  ;;  %602 = vst [vmem:[%s1148_s5 + $0xb8] sm:$0xff] %v533_v29 }
 0x20b   :  { %285 = vst [vmem:[%s1148_s5 + $0x60] sm:$0xff] %v269_v30  ;;  %286 = vst [vmem:[%s1148_s5 + $0x68] sm:$0xff] %v270_v9  ;;  %v514_v20 = vpop.permute.xlu0 %513 }
 0x20c   :  { %v255_v21 = vpop.permute.xlu1 %254  ;;  %v536_v35 = vmul.f32 %v842_v32, %v514_v20  ;;  %v537_v36 = vmul.f32 %v847_v33, %v514_v20 }
 0x20d   :  { %v271_v13 = vmul.f32 %v255_v21, %v878_v41  ;;  %v272_v16 = vmul.f32 %v255_v21, %v883_v42 }
 0x20e   :  { %605 = vst [vmem:[%s1148_s5 + $0xd0] sm:$0xff] %v536_v35  ;;  %606 = vst [vmem:[%s1148_s5 + $0xd8] sm:$0xff] %v537_v36 }
 0x20f   :  { %287 = vst [vmem:[%s1148_s5 + $0x70] sm:$0xff] %v271_v13  ;;  %288 = vst [vmem:[%s1148_s5 + $0x78] sm:$0xff] %v272_v16 }
 0x210   :  { %v489_v32 = vpop.permute.xlu1 %488 }
 0x211   :  { %v526_v33 = vmul.f32 %v734_v5, %v489_v32  ;;  %v527_v41 = vmul.f32 %v739_v6, %v489_v32  ;;  %v524_v42 = vpop.permute.xlu0 %523 }
 0x212   :  { %v540_v61 = vmul.f32 %v890_v44, %v524_v42  ;;  %v541_v25 = vmul.f32 %v895_v45, %v524_v42 }
 0x213   :  { %595 = vst [vmem:[%s1148_s5 + $0x80] sm:$0xff] %v526_v33  ;;  %596 = vst [vmem:[%s1148_s5 + $0x88] sm:$0xff] %v527_v41 }
 0x214   :  { %609 = vst [vmem:[%s1148_s5 + $0xf0] sm:$0xff] %v540_v61  ;;  %610 = vst [vmem:[%s1148_s5 + $0xf8] sm:$0xff] %v541_v25  ;;  %v499_v5 = vpop.permute.xlu1 %498 }
 0x215   :  { %v530_v6 = vmul.f32 %v770_v14, %v499_v5  ;;  %v531_v44 = vmul.f32 %v775_v15, %v499_v5 }
 0x217   :  { %599 = vst [vmem:[%s1148_s5 + $0xa0] sm:$0xff] %v530_v6  ;;  %600 = vst [vmem:[%s1148_s5 + $0xa8] sm:$0xff] %v531_v44 }
 0x218   :  { %v509_v45 = vpop.permute.xlu1 %508 }
 0x219   :  { %v534_v28 = vmul.f32 %v818_v26, %v509_v45  ;;  %v535_v34 = vmul.f32 %v823_v27, %v509_v45 }
 0x21b   :  { %603 = vst [vmem:[%s1148_s5 + $0xc0] sm:$0xff] %v534_v28  ;;  %604 = vst [vmem:[%s1148_s5 + $0xc8] sm:$0xff] %v535_v34 }
 0x21c   :  { %v519_v14 = vpop.permute.xlu1 %518 }
 0x21d   :  { %v538_v15 = vmul.f32 %v866_v38, %v519_v14  ;;  %v539_v40 = vmul.f32 %v871_v39, %v519_v14 }
 0x21f   :  { %607 = vst [vmem:[%s1148_s5 + $0xe0] sm:$0xff] %v538_v15  ;;  %608 = vst [vmem:[%s1148_s5 + $0xe8] sm:$0xff] %v539_v40 }

</bundles_post_ra>
